<compile_context>
chip_gen: v7x
topology: tpu7x:2x2x1
jax: 0.10.0
libtpu: 0.0.40
codegen_flags: <defaults>
</compile_context>

<pallas_src>
import functools

import numpy as np
import jax
import jax.numpy as jnp
from jax.experimental import pallas as pl
from jax.experimental.pallas import tpu as pltpu


def _cutout_kernel(num_masks, tb, params_ref, x_ref, o_ref):
    """One grid step = (TB batch rows) x (one time tile).

    params_ref : SMEM int32 (B_pad * num_masks * 4,) scalar-prefetch ref,
                 packed as [f0, w, t0, h] per (batch, mask).
    x_ref/o_ref: VMEM (TB, F, TT) tiles (partial trailing blocks are masked
                 on writeback by Pallas).
    """
    bi = pl.program_id(0)
    tj = pl.program_id(1)
    _, F, TT = x_ref.shape
    t_start = tj * TT

    # Separable per-axis index vectors (small: (F,1) and (1,TT)), hoisted out
    # of the row loop.
    rows = jax.lax.broadcasted_iota(jnp.int32, (F, 1), 0)
    cols = jax.lax.broadcasted_iota(jnp.int32, (1, TT), 1) + t_start

    def row_body(j, carry):
        b = bi * tb + j
        base0 = b * (num_masks * 4)

        # Seed the mask with the first rectangle (no zeros-bool tile + OR).
        f0 = params_ref[base0 + 0]
        fw = params_ref[base0 + 1]
        t0 = params_ref[base0 + 2]
        th = params_ref[base0 + 3]
        mask = ((rows >= f0) & (rows < f0 + fw)) & \
               ((cols >= t0) & (cols < t0 + th))

        # num_masks is a small static constant -> unrolled python loop.
        for i in range(1, num_masks):
            base = base0 + 4 * i
            f0 = params_ref[base + 0]
            fw = params_ref[base + 1]
            t0 = params_ref[base + 2]
            th = params_ref[base + 3]
            mask = mask | (((rows >= f0) & (rows < f0 + fw)) &
                           ((cols >= t0) & (cols < t0 + th)))

        xj = x_ref[j]
        o_ref[j] = jnp.where(mask, jnp.zeros((), xj.dtype), xj)
        return carry

    jax.lax.fori_loop(0, tb, row_body, 0, unroll=2)


def _cdiv(a, b):
    return -(-a // b)


def _round_up(a, m):
    return ((a + m - 1) // m) * m


def _hw_budget():
    """Generation-aware (tile byte cap, vmem_limit_bytes)."""
    vmem_bytes = 128 << 20
    try:
        info = pltpu.get_tpu_info()
        vmem_bytes = int(getattr(info, "vmem_capacity_bytes", vmem_bytes))
    except Exception:
        pass
    if vmem_bytes <= (64 << 20):
        # v7x: 64 MiB VMEM, ~3.2 TB/s HBM -> bigger tiles pay; keep headroom.
        return 6 << 20, 40 << 20
    # v5e / v6e: 128 MiB VMEM; 4 MiB tiles already sit near the HBM roofline.
    return 4 << 20, 32 << 20


def cutout_augment(x, f0, w, t0, h):
    """Apply cutout masks to x.

    x            : (B, F, T) float array
    f0, w, t0, h : (B, num_masks) int32 arrays (rectangle starts / extents)
    """
    B, F, T = x.shape
    num_masks = int(f0.shape[1]) if f0.ndim == 2 else 0
    if num_masks == 0:
        return x  # masks=0 -> identity

    itemsize = jnp.dtype(x.dtype).itemsize
    tile_cap, vmem_limit = _hw_budget()

    # ---- lane-dense time tile, ragged grid (no wrapper-side padding) ----
    TT_CAP = 2048
    t_pad = _round_up(T, 128)
    # Full-T block when it fits (always a legal block shape); otherwise a
    # fixed large multiple-of-128 tile with a partial trailing block.
    TT = T if t_pad <= TT_CAP else TT_CAP

    row_bytes = F * _round_up(TT, 128) * itemsize
    TB = int(max(1, min(B, tile_cap // max(row_bytes, 1))))

    grid_b = _cdiv(B, TB)
    grid_t = _cdiv(T, TT)

    # Megacore (v7x): make sure there are >= 2 programs on a parallel axis.
    if grid_b * grid_t < 2:
        if B >= 2:
            TB = _cdiv(B, 2)
            grid_b = _cdiv(B, TB)
        elif t_pad >= 256:
            TT = _round_up(_cdiv(T, 2), 128)
            grid_t = _cdiv(T, TT)

    # ---- pack rectangle params into one flat SMEM-friendly 1-D array ----
    # Padded on the batch axis so a partial last batch block never indexes
    # out of bounds in SMEM (tiny array -> negligible cost).
    params = jnp.stack([f0, w, t0, h], axis=-1).astype(jnp.int32)  # (B, M, 4)
    b_pad = grid_b * TB
    if b_pad != B:
        params = jnp.pad(params, ((0, b_pad - B), (0, 0), (0, 0)))
    params = params.reshape(-1)                                     # (b_pad*M*4,)

    kernel = functools.partial(_cutout_kernel, num_masks, TB)

    grid_spec = pltpu.PrefetchScalarGridSpec(
        num_scalar_prefetch=1,
        grid=(grid_b, grid_t),
        in_specs=[pl.BlockSpec((TB, F, TT), lambda i, j, p: (i, 0, j))],
        out_specs=pl.BlockSpec((TB, F, TT), lambda i, j, p: (i, 0, j)),
    )

    return pl.pallas_call(
        kernel,
        out_shape=jax.ShapeDtypeStruct((B, F, T), x.dtype),
        grid_spec=grid_spec,
        # Operand indices count the scalar-prefetch arg: params=0, x=1.
        input_output_aliases={1: 0},
        compiler_params=pltpu.CompilerParams(
            dimension_semantics=("parallel", "parallel"),
            vmem_limit_bytes=vmem_limit),
    )(params, x)


def sample_cutout_params(rng, batch, freq, time,
                         masks, min_freq, max_freq, min_time, max_time):
    """Glue: deterministic sampling matching the PyTorch module's RNG logic.

    Mirrors:  w = randint(min_freq, max_freq+1)
              h = randint(min_time, max_time+1)
              f0 = int(uniform(0, F - w)); t0 = int(uniform(0, T - h))
    """
    n = max(masks, 1)
    f0 = np.zeros((batch, n), np.int32)
    w = np.zeros((batch, n), np.int32)
    t0 = np.zeros((batch, n), np.int32)
    h = np.zeros((batch, n), np.int32)
    for b in range(batch):
        for i in range(masks):
            wi = rng.integers(min_freq, max_freq + 1)
            hi = rng.integers(min_time, max_time + 1)
            f0i = int(rng.uniform(0, freq - wi))
            t0i = int(rng.uniform(0, time - hi))
            w[b, i] = wi
            h[b, i] = hi
            f0[b, i] = f0i
            t0[b, i] = t0i
    if masks == 0:
        w[:] = 0
        h[:] = 0
    return (jnp.asarray(f0), jnp.asarray(w), jnp.asarray(t0), jnp.asarray(h))


def reference_cutout(x_np, f0, w, t0, h):
    """Pure-NumPy reference reproducing the PyTorch masked_fill semantics."""
    f0, w, t0, h = map(np.array, (f0, w, t0, h))
    out = x_np.copy()
    B = out.shape[0]
    for b in range(B):
        for i in range(f0.shape[1]):
            out[b, f0[b, i]:f0[b, i] + w[b, i],
                   t0[b, i]:t0[b, i] + h[b, i]] = 0.0
    return out


if __name__ == "__main__":
    # Small shapes consistent with (batch, freq, time) spectrogram features.
    # T=200 deliberately not a multiple of 128 to exercise the ragged path.
    B, F, T = 4, 16, 200
    MASKS = 2
    MIN_FREQ, MAX_FREQ = 3, 6     # cutout width along freq axis
    MIN_TIME, MAX_TIME = 4, 8     # cutout height along time axis

    key = jax.random.PRNGKey(0)
    x = jax.random.normal(key, (B, F, T), dtype=jnp.float32)
    x_np = np.array(x)  # snapshot before the (aliased) kernel call

    rng = np.random.default_rng(0)
    f0, w, t0, h = sample_cutout_params(
        rng, B, F, T, MASKS, MIN_FREQ, MAX_FREQ, MIN_TIME, MAX_TIME)

    out = cutout_augment(x, f0, w, t0, h)
    out = jax.block_until_ready(out)

    ref = reference_cutout(x_np, f0, w, t0, h)
    np.testing.assert_allclose(np.array(out), ref, rtol=0, atol=0)

    print("KERNEL_OK")
</pallas_src>

<mosaic_0001>
module attributes {stable_mosaic.version = 11 : i64} {
  func.func @_cutout_kernel(%arg0: i32, %arg1: i32, %arg2: memref<32xi32, #tpu.memory_space<smem>>, %arg3: memref<2x16x200xf32, #tpu.memory_space<vmem>>, %arg4: memref<2x16x200xf32, #tpu.memory_space<vmem>>) attributes {dimension_semantics = [#tpu.dimension_semantics<parallel>, #tpu.dimension_semantics<parallel>], iteration_bounds = array<i64: 2, 1>, scalar_prefetch = 1 : i64, scratch_operands = 0 : i64, tpu.core_type = #tpu.core_type<tc>, window_params = [{transform_indices = @transform_0, window_bounds = array<i64: 2, 16, 200>}, {transform_indices = @transform_1, window_bounds = array<i64: 2, 16, 200>}]} {
    %c200_i32 = arith.constant 200 : i32
    %0 = arith.muli %arg1, %c200_i32 : i32
    %1 = tpu.iota {dimensions = array<i32: 0>} : vector<16x1xi32>
    %2 = tpu.iota {dimensions = array<i32: 1>} : vector<1x200xi32>
    %3 = vector.broadcast %0 : i32 to vector<1x200xi32>
    %4 = arith.addi %2, %3 : vector<1x200xi32>
    %c0_i32 = arith.constant 0 : i32
    %c2_i32 = arith.constant 2 : i32
    %5 = arith.muli %arg0, %c2_i32 : i32
    %6 = arith.addi %5, %c0_i32 : i32
    %c8_i32 = arith.constant 8 : i32
    %7 = arith.muli %6, %c8_i32 : i32
    %c0_i32_0 = arith.constant 0 : i32
    %8 = arith.addi %7, %c0_i32_0 : i32
    %9 = arith.index_cast %8 : i32 to index
    %10 = memref.load %arg2[%9] : memref<32xi32, #tpu.memory_space<smem>>
    %c1_i32 = arith.constant 1 : i32
    %11 = arith.addi %7, %c1_i32 : i32
    %12 = arith.index_cast %11 : i32 to index
    %13 = memref.load %arg2[%12] : memref<32xi32, #tpu.memory_space<smem>>
    %c2_i32_1 = arith.constant 2 : i32
    %14 = arith.addi %7, %c2_i32_1 : i32
    %15 = arith.index_cast %14 : i32 to index
    %16 = memref.load %arg2[%15] : memref<32xi32, #tpu.memory_space<smem>>
    %c3_i32 = arith.constant 3 : i32
    %17 = arith.addi %7, %c3_i32 : i32
    %18 = arith.index_cast %17 : i32 to index
    %19 = memref.load %arg2[%18] : memref<32xi32, #tpu.memory_space<smem>>
    %20 = vector.broadcast %10 : i32 to vector<16x1xi32>
    %21 = arith.cmpi sge, %1, %20 : vector<16x1xi32>
    %22 = arith.addi %10, %13 : i32
    %23 = vector.broadcast %22 : i32 to vector<16x1xi32>
    %24 = arith.cmpi slt, %1, %23 : vector<16x1xi32>
    %25 = arith.andi %21, %24 : vector<16x1xi1>
    %26 = vector.broadcast %16 : i32 to vector<1x200xi32>
    %27 = arith.cmpi sge, %4, %26 : vector<1x200xi32>
    %28 = arith.addi %16, %19 : i32
    %29 = vector.broadcast %28 : i32 to vector<1x200xi32>
    %30 = arith.cmpi slt, %4, %29 : vector<1x200xi32>
    %31 = arith.andi %27, %30 : vector<1x200xi1>
    %32 = vector.broadcast %25 : vector<16x1xi1> to vector<16x200xi1>
    %33 = vector.broadcast %31 : vector<1x200xi1> to vector<16x200xi1>
    %34 = arith.andi %32, %33 : vector<16x200xi1>
    %c4_i32 = arith.constant 4 : i32
    %35 = arith.addi %7, %c4_i32 : i32
    %c0_i32_2 = arith.constant 0 : i32
    %36 = arith.addi %35, %c0_i32_2 : i32
    %37 = arith.index_cast %36 : i32 to index
    %38 = memref.load %arg2[%37] : memref<32xi32, #tpu.memory_space<smem>>
    %c1_i32_3 = arith.constant 1 : i32
    %39 = arith.addi %35, %c1_i32_3 : i32
    %40 = arith.index_cast %39 : i32 to index
    %41 = memref.load %arg2[%40] : memref<32xi32, #tpu.memory_space<smem>>
    %c2_i32_4 = arith.constant 2 : i32
    %42 = arith.addi %35, %c2_i32_4 : i32
    %43 = arith.index_cast %42 : i32 to index
    %44 = memref.load %arg2[%43] : memref<32xi32, #tpu.memory_space<smem>>
    %c3_i32_5 = arith.constant 3 : i32
    %45 = arith.addi %35, %c3_i32_5 : i32
    %46 = arith.index_cast %45 : i32 to index
    %47 = memref.load %arg2[%46] : memref<32xi32, #tpu.memory_space<smem>>
    %48 = vector.broadcast %38 : i32 to vector<16x1xi32>
    %49 = arith.cmpi sge, %1, %48 : vector<16x1xi32>
    %50 = arith.addi %38, %41 : i32
    %51 = vector.broadcast %50 : i32 to vector<16x1xi32>
    %52 = arith.cmpi slt, %1, %51 : vector<16x1xi32>
    %53 = arith.andi %49, %52 : vector<16x1xi1>
    %54 = vector.broadcast %44 : i32 to vector<1x200xi32>
    %55 = arith.cmpi sge, %4, %54 : vector<1x200xi32>
    %56 = arith.addi %44, %47 : i32
    %57 = vector.broadcast %56 : i32 to vector<1x200xi32>
    %58 = arith.cmpi slt, %4, %57 : vector<1x200xi32>
    %59 = arith.andi %55, %58 : vector<1x200xi1>
    %60 = vector.broadcast %53 : vector<16x1xi1> to vector<16x200xi1>
    %61 = vector.broadcast %59 : vector<1x200xi1> to vector<16x200xi1>
    %62 = arith.andi %60, %61 : vector<16x200xi1>
    %63 = arith.ori %34, %62 : vector<16x200xi1>
    %64 = arith.index_cast %c0_i32 : i32 to index
    %c0 = arith.constant 0 : index
    %c0_6 = arith.constant 0 : index
    %65 = vector.load %arg3[%64, %c0, %c0_6] : memref<2x16x200xf32, #tpu.memory_space<vmem>>, vector<1x16x200xf32>
    %66 = vector.shape_cast %65 : vector<1x16x200xf32> to vector<16x200xf32>
    %cst = arith.constant 0.000000e+00 : f32
    %67 = vector.broadcast %cst : f32 to vector<16x200xf32>
    %68 = arith.select %63, %67, %66 : vector<16x200xi1>, vector<16x200xf32>
    %69 = arith.index_cast %c0_i32 : i32 to index
    %c0_7 = arith.constant 0 : index
    %c0_8 = arith.constant 0 : index
    %70 = vector.load %arg4[%69, %c0_7, %c0_8] : memref<2x16x200xf32, #tpu.memory_space<vmem>>, vector<1x16x200xf32>
    %71 = vector.shape_cast %70 : vector<1x16x200xf32> to vector<16x200xf32>
    %72 = vector.shape_cast %68 : vector<16x200xf32> to vector<1x16x200xf32>
    tpu.vector_store %arg4[%69, %c0_7, %c0_8], %72 {strides = array<i32>} : memref<2x16x200xf32, #tpu.memory_space<vmem>>, vector<1x16x200xf32>,
    %c1_i32_9 = arith.constant 1 : i32
    %c2_i32_10 = arith.constant 2 : i32
    %73 = arith.muli %arg0, %c2_i32_10 : i32
    %74 = arith.addi %73, %c1_i32_9 : i32
    %c8_i32_11 = arith.constant 8 : i32
    %75 = arith.muli %74, %c8_i32_11 : i32
    %c0_i32_12 = arith.constant 0 : i32
    %76 = arith.addi %75, %c0_i32_12 : i32
    %77 = arith.index_cast %76 : i32 to index
    %78 = memref.load %arg2[%77] : memref<32xi32, #tpu.memory_space<smem>>
    %c1_i32_13 = arith.constant 1 : i32
    %79 = arith.addi %75, %c1_i32_13 : i32
    %80 = arith.index_cast %79 : i32 to index
    %81 = memref.load %arg2[%80] : memref<32xi32, #tpu.memory_space<smem>>
    %c2_i32_14 = arith.constant 2 : i32
    %82 = arith.addi %75, %c2_i32_14 : i32
    %83 = arith.index_cast %82 : i32 to index
    %84 = memref.load %arg2[%83] : memref<32xi32, #tpu.memory_space<smem>>
    %c3_i32_15 = arith.constant 3 : i32
    %85 = arith.addi %75, %c3_i32_15 : i32
    %86 = arith.index_cast %85 : i32 to index
    %87 = memref.load %arg2[%86] : memref<32xi32, #tpu.memory_space<smem>>
    %88 = vector.broadcast %78 : i32 to vector<16x1xi32>
    %89 = arith.cmpi sge, %1, %88 : vector<16x1xi32>
    %90 = arith.addi %78, %81 : i32
    %91 = vector.broadcast %90 : i32 to vector<16x1xi32>
    %92 = arith.cmpi slt, %1, %91 : vector<16x1xi32>
    %93 = arith.andi %89, %92 : vector<16x1xi1>
    %94 = vector.broadcast %84 : i32 to vector<1x200xi32>
    %95 = arith.cmpi sge, %4, %94 : vector<1x200xi32>
    %96 = arith.addi %84, %87 : i32
    %97 = vector.broadcast %96 : i32 to vector<1x200xi32>
    %98 = arith.cmpi slt, %4, %97 : vector<1x200xi32>
    %99 = arith.andi %95, %98 : vector<1x200xi1>
    %100 = vector.broadcast %93 : vector<16x1xi1> to vector<16x200xi1>
    %101 = vector.broadcast %99 : vector<1x200xi1> to vector<16x200xi1>
    %102 = arith.andi %100, %101 : vector<16x200xi1>
    %c4_i32_16 = arith.constant 4 : i32
    %103 = arith.addi %75, %c4_i32_16 : i32
    %c0_i32_17 = arith.constant 0 : i32
    %104 = arith.addi %103, %c0_i32_17 : i32
    %105 = arith.index_cast %104 : i32 to index
    %106 = memref.load %arg2[%105] : memref<32xi32, #tpu.memory_space<smem>>
    %c1_i32_18 = arith.constant 1 : i32
    %107 = arith.addi %103, %c1_i32_18 : i32
    %108 = arith.index_cast %107 : i32 to index
    %109 = memref.load %arg2[%108] : memref<32xi32, #tpu.memory_space<smem>>
    %c2_i32_19 = arith.constant 2 : i32
    %110 = arith.addi %103, %c2_i32_19 : i32
    %111 = arith.index_cast %110 : i32 to index
    %112 = memref.load %arg2[%111] : memref<32xi32, #tpu.memory_space<smem>>
    %c3_i32_20 = arith.constant 3 : i32
    %113 = arith.addi %103, %c3_i32_20 : i32
    %114 = arith.index_cast %113 : i32 to index
    %115 = memref.load %arg2[%114] : memref<32xi32, #tpu.memory_space<smem>>
    %116 = vector.broadcast %106 : i32 to vector<16x1xi32>
    %117 = arith.cmpi sge, %1, %116 : vector<16x1xi32>
    %118 = arith.addi %106, %109 : i32
    %119 = vector.broadcast %118 : i32 to vector<16x1xi32>
    %120 = arith.cmpi slt, %1, %119 : vector<16x1xi32>
    %121 = arith.andi %117, %120 : vector<16x1xi1>
    %122 = vector.broadcast %112 : i32 to vector<1x200xi32>
    %123 = arith.cmpi sge, %4, %122 : vector<1x200xi32>
    %124 = arith.addi %112, %115 : i32
    %125 = vector.broadcast %124 : i32 to vector<1x200xi32>
    %126 = arith.cmpi slt, %4, %125 : vector<1x200xi32>
    %127 = arith.andi %123, %126 : vector<1x200xi1>
    %128 = vector.broadcast %121 : vector<16x1xi1> to vector<16x200xi1>
    %129 = vector.broadcast %127 : vector<1x200xi1> to vector<16x200xi1>
    %130 = arith.andi %128, %129 : vector<16x200xi1>
    %131 = arith.ori %102, %130 : vector<16x200xi1>
    %132 = arith.index_cast %c1_i32_9 : i32 to index
    %c0_21 = arith.constant 0 : index
    %c0_22 = arith.constant 0 : index
    %133 = vector.load %arg3[%132, %c0_21, %c0_22] : memref<2x16x200xf32, #tpu.memory_space<vmem>>, vector<1x16x200xf32>
    %134 = vector.shape_cast %133 : vector<1x16x200xf32> to vector<16x200xf32>
    %cst_23 = arith.constant 0.000000e+00 : f32
    %135 = vector.broadcast %cst_23 : f32 to vector<16x200xf32>
    %136 = arith.select %131, %135, %134 : vector<16x200xi1>, vector<16x200xf32>
    %137 = arith.index_cast %c1_i32_9 : i32 to index
    %c0_24 = arith.constant 0 : index
    %c0_25 = arith.constant 0 : index
    %138 = vector.load %arg4[%137, %c0_24, %c0_25] : memref<2x16x200xf32, #tpu.memory_space<vmem>>, vector<1x16x200xf32>
    %139 = vector.shape_cast %138 : vector<1x16x200xf32> to vector<16x200xf32>
    %140 = vector.shape_cast %136 : vector<16x200xf32> to vector<1x16x200xf32>
    tpu.vector_store %arg4[%137, %c0_24, %c0_25], %140 {strides = array<i32>} : memref<2x16x200xf32, #tpu.memory_space<vmem>>, vector<1x16x200xf32>,
    %c2_i32_26 = arith.constant 2 : i32
    return
  }
  func.func @transform_0(%arg0: i32, %arg1: i32, %arg2: memref<32xi32, #tpu.memory_space<smem>>) -> (i32, i32, i32) {
    %c0_i32 = arith.constant 0 : i32
    %c0_i32_0 = arith.constant 0 : i32
    return %arg0, %c0_i32, %arg1 : i32, i32, i32
  }
  func.func @transform_1(%arg0: i32, %arg1: i32, %arg2: memref<32xi32, #tpu.memory_space<smem>>) -> (i32, i32, i32) {
    %c0_i32 = arith.constant 0 : i32
    %c0_i32_0 = arith.constant 0 : i32
    return %arg0, %c0_i32, %arg1 : i32, i32, i32
  }
}

</mosaic_0001>

<bundles_post_ra>
// kernel: tpu_custom_call.1
= control target key start
LH: loop header
LB: loop body
LE: loop exit
PB: predicated region body
PF: predicated region fallthrough
CT: control target
= control target key end

     0   :  { %s1174_s0 = inlined_call_operand.vmem [shape: s32[32], index: 0, kind: input, shape index: {}]   ;;  %s1175_s1 = inlined_call_operand.hbm [shape: f32[4,16,200], index: 1, kind: input, shape index: {}, may-alias: {1,2}]   ;;  %s1176_s2 = inlined_call_operand.hbm [shape: f32[4,16,200], index: 2, kind: output, shape index: {}, may-alias: {1,2}]  }
   0x1   :  { %s7_s11 = sshll.u32 %s1174_s0, 4  ;;  %s8_s11 = int_to_ptr.vmem [resolvable:$true] %s7_s11 }
   0x2   :  { %s570_s12 = scalar_lea.vmem %s8_s11, 16  ;;  %p575_p1 = scmp.lt.s32.totalorder %s8_s11, %s8_s11 }
   0x3   :  { %p571_p0 = scmp.ne.s32.totalorder %s8_s11, %s570_s12  ;;  %p576_p2 = scmp.lt.s32.totalorder %s570_s12, %s570_s12 }
   0x5   :  { %p577_p3 = por %p576_p2, %p575_p1 }
   0x7   :  { %p578_p4 = pnand %p577_p3, %p571_p0 }
   0x9   :  { %581 = shalt.err (!%p578_p4)  }
   0xa   :  { %s698_s13 = smov [#allocation3]  }
   0xb   :  { %10 = dma.vmem_to_smem %s8_s11, 16, %s698_s13, [#allocation2] }
   0xc   :  { %664 = dma.done.wait [#allocation2], 16 }
   0xd   :  { %665 = vsyncadd [#allocation2], 4294967280 }
   0xe   :  { %12 = sfence }
   0xf   :  { %13 = vsyncpa [#allocation5], 0 }
  0x10   :  { %15 = vsyncpa [#allocation5 + $0x1], 0 }
  0x11   :  { %16 = vsyncpa [#allocation6], 0 }
  0x12   :  { %18 = vsyncpa [#allocation6 + $0x1], 0  ;;  %s723_s14 = smov 0   ;;  %s725_s0 = smov 0  }
  0x13   :  { %s727_s15 = smov 0   ;;  %s729_s16 = smov 0  }
  0x14   :  { %s731_s17 = smov 0   ;;  %s733_s18 = smov 0  }
  0x15 LB: > { %s468_s19 = sadd.s32 4294967295, %s696_s18   ;;  %s469_s20 = sadd.s32 4294967294, %s696_s18   ;;  %s696_s18 = sphi %s733_s18, %s24_s18   ;;  %s692_s17 = sphi %s731_s17, %s1229_s17   ;;  %s688_s16 = sphi %s729_s16, %s1228_s16   ;;  %s684_s15 = sphi %s727_s15, %s1227_s15   ;;  %s680_s0 = sphi %s725_s0, %s1226_s0   ;;  %s676_s14 = sphi %s723_s14, %s1225_s14  }
  0x16   : > { %s36_s21 = sadd.s32 1, %s692_s17  ;;  %s45_s22 = sadd.s32 1, %s684_s15 }
  0x17   : > { %p38_p5 = scmp.ge.s32.totalorder %s36_s21, 2  ;;  %p52_p6 = scmp.ne.s32.totalorder %s684_s15, %s680_s0 }
  0x18   : > { %p53_p7 = scmp.eq.s32.totalorder %s696_s18, 0  ;;  %p58_p8 = scmp.ne.s32.totalorder %s680_s0, %s676_s14 }
  0x19   : > { %s1231_s21 = smov (%p38_p5, %s36_s21), 0  ;;  %p59_p10 = scmp.eq.s32.totalorder %s468_s19, 0 }
  0x1a   : > { %p764_p9 = por %p53_p7, %p52_p6  ;;  %s40_s24 = ssub.s32 %s692_s17, %s1231_s21 }
  0x1b   : > { %p84_p11 = scmp.eq.s32.totalorder %s468_s19, 1  ;;  %p43_p12 = scmp.eq.s32.totalorder %s40_s24, 0 }
  0x1c   : > { %p770_p13 = por %p59_p10, %p58_p8  ;;  %p90_p1 = scmp.eq.s32.totalorder %s469_s20, 1 }
  0x1d   : > { %p774_p0 = por %p84_p11, %p52_p6  ;;  %p515_p4 = scmp.lt.s32.totalorder %s696_s18, 2 }
  0x1e   : > { %s779_s27 = scalar_select %p43_p12, %s684_s15, %s45_s22  }
  0x1f   : > { %s1180_s26 = scalar_select %p774_p0, 1, 0 }
  0x20   : > { %p781_p2 = por %p90_p1, %p58_p8  ;;  %s110_s29 = sand.u32 1, %s684_s15  }
  0x21   : > { %s472_s30 = sshll.u32 %s110_s29, 6  ;;  %s497_s3 = sshll.u32 %s692_s17, 10 }
  0x22   : > { %s1181_s28 = scalar_select %p781_p2, 1, 0 }
  0x23   : > { %s792_s6 = scalar_lea.hbm %s1175_s1, %s497_s3  ;;  %s114_s7 = scalar_lea.vmem [#allocation4], %s472_s30 }
  0x24   : > { %s124_s8 = sshll.u32 %s114_s7, 4  ;;  %p798_p5 = pnand %p515_p4, %p764_p9  ;;  %s794_s8 = int_to_ptr.vmem [resolvable:$true] %s124_s8 }
  0x25   : > { %s803_s10 = scalar_lea.sflag [#allocation5], %s110_s29  ;;  %s582_s11 = scalar_lea.hbm %s792_s6, 1024 }
  0x26   : > { %p583_p7 = scmp.ne.s32.totalorder %s792_s6, %s582_s11  ;;  %p584_p8 = pneg %p798_p5 }
  0x27   : > { %s587_s19 = scalar_lea.hbm %s1175_s1, 2048  ;;  %p588_p9 = scmp.lt.u32.totalorder %s792_s6, %s1175_s1 }
  0x28   : > { %p585_p10 = pnand %p584_p8, %p583_p7  ;;  %p589_p12 = scmp.lt.u32.totalorder %s587_s19, %s582_s11 }
  0x29   : > { %p591_p4 = scmp.lt.u32.totalorder %s582_s11, %s792_s6 }
  0x2a   : > { %p586_p11 = pneg %p585_p10  ;;  %p590_p1 = por %p589_p12, %p588_p9 }
  0x2c   : > { %p592_p3 = por %p591_p4, %p590_p1 }
  0x2e   : > { %p593_p6 = pnand %p592_p3, %p586_p11 }
  0x30   : > { %596 = shalt.err (!%p593_p6)
}
  0x31   : > { %s597_s23 = scalar_lea.vmem %s794_s8, 1024  ;;  %s699_s24 = smov [#allocation4]  }
  0x32   : > { %p598_p7 = scmp.ne.s32.totalorder %s794_s8, %s597_s23  ;;  %s602_s29 = sshll.u32 %s699_s24, 4  ;;  %s603_s29 = int_to_ptr.vmem [resolvable:$false] %s602_s29 }
  0x33   : > { %s604_s30 = scalar_lea.vmem %s603_s29, 2048  ;;  %p605_p0 = scmp.lt.s32.totalorder %s794_s8, %s603_s29 }
  0x34   : > { %p600_p10 = pnand %p598_p7, %p584_p8  ;;  %p606_p9 = scmp.lt.s32.totalorder %s604_s30, %s597_s23 }
  0x36   : > { %p601_p2 = pneg %p600_p10  ;;  %p607_p12 = por %p606_p9, %p605_p0 }
  0x38   : > { %p608_p1 = pnand %p607_p12, %p601_p2 }
  0x3a   : > { %611 = shalt.err (!%p608_p1)
}
  0x3b   : > { %s700_s3 = smov 256   ;;  %s701_s4 = smov 16  }
  0x3c   : > { %510 = dma.hbm_to_vmem [thread:$0]  (!%p798_p5), %s792_s6, 1024, %s794_s8, %s803_s10, %s700_s3, %s700_s3, %s701_s4  }
  0x3d   : > { %p132_p3 = scmp.lt.s32.totalorder %s696_s18, 3  ;;  %p1183_p6 = scmp.ge.s32.totalorder %s696_s18, 1 }
  0x3f   : > { %p133_p8 = pnand %p1183_p6, %p132_p3 }
  0x40   : > { %s835_s5 = sand.u32 (!%p133_p8), 1, %s680_s0  }
  0x41   : > { %136 = sbr.rel (%p133_p8) target bundleno = 140 (0x8c), region = 24  ;;  %s477_s7 = sshll.u32 (!%p133_p8), %s835_s5, 6 }
  0x42   : > { %s139_s11 = scalar_lea.sflag (!%p133_p8), [#allocation5], %s835_s5  ;;  %s841_s12 = scalar_lea.vmem (!%p133_p8), [#allocation4], %s477_s7 }
  0x48   : > { %667 = dma.done.wait (%p770_p13), %s139_s11, 1024  }
  0x49   : > { %669 = vsyncadd (%p770_p13), %s139_s11, 4294966272  ;;  %v166_v0 = vlaneseq  ;;  %s479_s6 = sshll.u32 %s688_s16, 4  ;;  %v255_v22 = vld [vmem:[%s841_s12] sm:$0xff]  ;;  %v256_v25 = vld [vmem:[%s841_s12 + $0x8] sm:$0xff]  ;;  %p1222_p0 = scmp.ne.s32.totalorder %s1180_s26, 0 }
  0x4a   : > { %s176_s8 = sld [smem:[#allocation3 + %s479_s6]]  ;;  %s177_s9 = sadd.s32 1, %s479_s6  ;;  %v257_v29 = vld [vmem:[%s841_s12 + $0x10] sm:$0xff]  ;;  %v258_v35 = vld [vmem:[%s841_s12 + $0x18] sm:$0xff]  ;;  %v482_v45 = vld [vmem:[%s841_s12 + $0x20] sm:$0xff] }
  0x4b   : > { %v848_v1 = vshrl.u32 %v166_v0, 7  ;;  %s178_s10 = sld [smem:[#allocation3 + %s177_s9]]  ;;  %s179_s13 = sadd.s32 2, %s479_s6  ;;  %v852_v2 = vand.u32 127, %v166_v0  ;;  %v483_v49 = vld [vmem:[%s841_s12 + $0x28] sm:$0xff]  ;;  %v484_v52 = vld [vmem:[%s841_s12 + $0x30] sm:$0xff] }
  0x4c   : > { %s850_s19 = sld [smem:[#allocation3 + %s179_s13]]  ;;  %s181_s20 = sadd.s32 3, %s479_s6  ;;  %v485_v54 = vld [vmem:[%s841_s12 + $0x38] sm:$0xff] }
  0x4d   : > { %s182_s22 = sld [smem:[#allocation3 + %s181_s20]]  ;;  %s213_s23 = sadd.s32 4, %s479_s6  ;;  %v857_v3 = vadd.s32 8, %v848_v1  ;;  %v866_v7 = vadd.s32 128, %v852_v2 }
  0x4e   : > { %s854_s24 = sld [smem:[#allocation3 + %s213_s23]]  ;;  %s215_s25 = sadd.s32 5, %s479_s6 }
  0x4f   : > { %s216_s29 = sld [smem:[#allocation3 + %s215_s25]]  ;;  %s217_s30 = sadd.s32 6, %s479_s6 }
  0x50   : > { %v183_v4 = vstv %s176_s8  ;;  %s859_s3 = sld [smem:[#allocation3 + %s217_s30]]  ;;  %s219_s4 = sadd.s32 7, %s479_s6 }
  0x51   : > { %vm184_vm0 = vcmp.ge.s32.totalorder %v848_v1, %v183_v4  ;;  %s186_s11 = sadd.s32 %s178_s10, %s176_s8  ;;  %s862_s9 = sld [smem:[#allocation3 + %s219_s4]]  ;;  %vm874_vm3 = vcmp.ge.s32.totalorder %v857_v3, %v183_v4 }
  0x52   : > { %v187_v5 = vstv %s186_s11  ;;  %v192_v6 = vstv %s850_s19  ;;  %s868_s13 = sadd.s32 8, %s479_s6  ;;  %s702_s12 = smov [#allocation7]  }
  0x53   : > { %vm188_vm1 = vcmp.lt.s32.totalorder %v848_v1, %v187_v5  ;;  %vm193_vm2 = vcmp.ge.s32.totalorder %v852_v2, %v192_v6  ;;  %s195_s20 = sadd.s32 %s182_s22, %s850_s19  ;;  %vm189_vm4 = vcmp.lt.s32.totalorder %v857_v3, %v187_v5  ;;  %s885_s6 = sld [smem:[#allocation3 + %s868_s13]]  ;;  %vm903_vm9 = vcmp.ge.s32.totalorder %v866_v7, %v192_v6 }
  0x54   : > { %vm879_vm5 = vmand %vm184_vm0, %vm188_vm1  ;;  %v196_v10 = vstv %s195_s20  ;;  %v221_v11 = vstv %s854_s24  ;;  %s272_s8 = sadd.s32 1, %s868_s13  ;;  %s274_s22 = sadd.s32 2, %s868_s13 }
  0x55   : > { %vm197_vm6 = vcmp.lt.s32.totalorder %v852_v2, %v196_v10  ;;  %vm890_vm7 = vcmp.ge.s32.totalorder %v848_v1, %v221_v11  ;;  %s224_s10 = sadd.s32 %s216_s29, %s854_s24  ;;  %s895_s19 = sld [smem:[#allocation3 + %s272_s8]]  ;;  %vm198_vm10 = vcmp.lt.s32.totalorder %v866_v7, %v196_v10  ;;  %vm912_vm11 = vmand %vm874_vm3, %vm189_vm4 }
  0x56   : > { %vm897_vm8 = vmand %vm193_vm2, %vm197_vm6  ;;  %v225_v14 = vstv %s224_s10  ;;  %v230_v15 = vstv %s859_s3  ;;  %s276_s23 = sadd.s32 3, %s868_s13  ;;  %s926_s25 = sld [smem:[#allocation3 + %s274_s22]] }
  0x57   : > { %vm209_vm12 = vmand %vm879_vm5, %vm897_vm8  ;;  %vm226_vm13 = vcmp.lt.s32.totalorder %v848_v1, %v225_v14  ;;  %vm231_vm14 = vcmp.ge.s32.totalorder %v852_v2, %v230_v15  ;;  %s233_s24 = sadd.s32 %s862_s9, %s859_s3  ;;  %s934_s29 = sld [smem:[#allocation3 + %s276_s23]]  ;;  %vm232_vm4 = vcmp.ge.s32.totalorder %v866_v7, %v230_v15 }
  0x58   : > { %vm930_vm15 = vmand %vm890_vm7, %vm226_vm13  ;;  %v234_v19 = vstv %s233_s24  ;;  %s308_s30 = sadd.s32 4, %s868_s13  ;;  %s310_s4 = sadd.s32 5, %s868_s13  ;;  %vm223_vm13 = vcmp.ge.s32.totalorder %v857_v3, %v221_v11 }
  0x59   : > { %vm235_vm0 = vcmp.lt.s32.totalorder %v852_v2, %v234_v19  ;;  %vm940_vm1 = vmand %vm903_vm9, %vm198_vm10  ;;  %s944_s3 = sld [smem:[#allocation3 + %s308_s30]]  ;;  %s312_s9 = sadd.s32 6, %s868_s13  ;;  %vm236_vm6 = vcmp.lt.s32.totalorder %v866_v7, %v234_v19  ;;  %v278_v27 = vstv %s885_s6 }
  0x5a   : > { %vm947_vm2 = vmand %vm231_vm14, %vm235_vm0  ;;  %s952_s11 = sld [smem:[#allocation3 + %s310_s4]]  ;;  %s314_s8 = sadd.s32 7, %s868_s13  ;;  %vm227_vm14 = vcmp.lt.s32.totalorder %v857_v3, %v225_v14 }
  0x5b   : > { %vm247_vm3 = vmand %vm930_vm15, %vm947_vm2  ;;  %s961_s20 = sld [smem:[#allocation3 + %s312_s9]]  ;;  %s977_s22 = scalar_lea.vmem [#allocation7], %s477_s7 }
  0x5c   : > { %vm251_vm7 = vmor %vm209_vm12, %vm247_vm3  ;;  %s973_s10 = sld [smem:[#allocation3 + %s314_s8]]  ;;  %vm264_vm12 = vcmask 588800   ;;  %s281_s7 = sadd.s32 %s895_s19, %s885_s6  ;;  %v287_v31 = vstv %s926_s25 }
  0x5d   : > { %v259_v23 = vsel %vm251_vm7, 0.0, %v255_v22  ;;  %vm210_vm9 = vmand %vm879_vm5, %vm940_vm1  ;;  %s290_s13 = sadd.s32 %s934_s29, %s926_s25  ;;  %v282_v30 = vstv %s281_s7  ;;  %s381_s23 = sshll.u32 %s977_s22, 4  ;;  %s1110_s23 = int_to_ptr.vmem [resolvable:$true] %s381_s23 }
  0x5e   : > { %263 = vst [vmem:[%s977_s22] sm:$0xff] %v259_v23  ;;  %vm980_vm10 = vmand %vm232_vm4, %vm236_vm6  ;;  %v291_v32 = vstv %s290_s13  ;;  %vm1017_vm6 = vcmp.ge.s32.totalorder %v848_v1, %v278_v27  ;;  %s501_s24 = sshll.u32 %s688_s16, 10  ;;  %s365_s30 = scalar_lea.sflag [#allocation6], %s835_s5 }
  0x5f   : > { %vm248_vm5 = vmand %vm930_vm15, %vm980_vm10  ;;  %v316_v36 = vstv %s944_s3  ;;  %s1123_s16 = scalar_lea.hbm %s1176_s2, %s501_s24  ;;  %s616_s4 = sshll.u32 %s702_s12, 4  ;;  %s617_s4 = int_to_ptr.vmem [resolvable:$false] %s616_s4 }
  0x60   : > { %vm252_vm0 = vmor %vm210_vm9, %vm248_vm5  ;;  %s319_s19 = sadd.s32 %s952_s11, %s944_s3  ;;  %vm288_vm5 = vcmp.ge.s32.totalorder %v852_v2, %v287_v31  ;;  %s612_s3 = scalar_lea.vmem %s1110_s23, 1024 }
  0x61   : > { %v260_v26 = vsel %vm252_vm0, 0.0, %v256_v25  ;;  %vm211_vm3 = vmand %vm912_vm11, %vm897_vm8  ;;  %v320_v37 = vstv %s319_s19  ;;  %v325_v38 = vstv %s961_s20  ;;  %p613_p13 = scmp.ne.s32.totalorder %s1110_s23, %s612_s3  ;;  %s618_s11 = scalar_lea.vmem %s617_s4, 2048 }
  0x62   : > { %265 = vst.msk [vmem:[%s977_s22 + $0x8] sm:$0xff] %vm264_vm12, %v260_v26  ;;  %vm1002_vm15 = vmand %vm223_vm13, %vm227_vm14  ;;  %s328_s6 = sadd.s32 %s973_s10, %s961_s20  ;;  %vm292_vm13 = vcmp.lt.s32.totalorder %v852_v2, %v291_v32  ;;  %vm317_vm14 = vcmp.ge.s32.totalorder %v848_v1, %v316_v36  ;;  %vm321_vm0 = vcmp.lt.s32.totalorder %v848_v1, %v320_v37  ;;  %p619_p11 = scmp.lt.s32.totalorder %s1110_s23, %s617_s4 }
  0x63   : > { %vm249_vm4 = vmand %vm1002_vm15, %vm947_vm2  ;;  %vm283_vm2 = vcmp.lt.s32.totalorder %v848_v1, %v282_v30  ;;  %v329_v39 = vstv %s328_s6  ;;  %p614_p2 = pnand %p613_p13, %p1222_p0  ;;  %p620_p4 = scmp.lt.s32.totalorder %s618_s11, %s612_s3 }
  0x64   : > { %vm253_vm8 = vmor %vm211_vm3, %vm249_vm4  ;;  %vm326_vm3 = vcmp.ge.s32.totalorder %v852_v2, %v325_v38 }
  0x65   : > { %v261_v34 = vsel %vm253_vm8, 0.0, %v257_v29  ;;  %vm212_vm7 = vmand %vm912_vm11, %vm940_vm1  ;;  %p615_p5 = pneg %p614_p2  ;;  %p621_p7 = por %p620_p4, %p619_p11 }
  0x66   : > { %266 = vst [vmem:[%s977_s22 + $0x10] sm:$0xff] %v261_v34  ;;  %vm250_vm9 = vmand %vm1002_vm15, %vm980_vm10  ;;  %vm330_vm15 = vcmp.lt.s32.totalorder %v852_v2, %v329_v39 }
  0x67   : > { %vm254_vm11 = vmor %vm212_vm7, %vm250_vm9  ;;  %vm289_vm7 = vcmp.ge.s32.totalorder %v866_v7, %v287_v31  ;;  %p622_p10 = pnand %p621_p7, %p615_p5 }
  0x68   : > { %v262_v40 = vsel %vm254_vm11, 0.0, %v258_v35  ;;  %vm1038_vm1 = vmand %vm1017_vm6, %vm283_vm2  ;;  %vm293_vm2 = vcmp.lt.s32.totalorder %v866_v7, %v291_v32  ;;  %vm331_vm11 = vcmp.lt.s32.totalorder %v866_v7, %v329_v39 }
  0x69   : > { %267 = vst.msk [vmem:[%s977_s22 + $0x18] sm:$0xff] %vm264_vm12, %v262_v40  ;;  %vm1046_vm10 = vmand %vm288_vm5, %vm292_vm13  ;;  %vm327_vm13 = vcmp.ge.s32.totalorder %v866_v7, %v325_v38 }
  0x6a   : > { %vm304_vm4 = vmand %vm1038_vm1, %vm1046_vm10 }
  0x6b   : > { %vm1056_vm8 = vmand %vm317_vm14, %vm321_vm0 }
  0x6c   : > { %vm1060_vm6 = vmand %vm326_vm3, %vm330_vm15  ;;  %vm280_vm15 = vcmp.ge.s32.totalorder %v857_v3, %v278_v27 }
  0x6d   : > { %vm342_vm9 = vmand %vm1056_vm8, %vm1060_vm6 }
  0x6e   : > { %vm346_vm5 = vmor %vm304_vm4, %vm342_vm9  ;;  %vm284_vm4 = vcmp.lt.s32.totalorder %v857_v3, %v282_v30  ;;  %vm318_vm9 = vcmp.ge.s32.totalorder %v857_v3, %v316_v36 }
  0x6f   : > { %v355_v46 = vsel %vm346_vm5, 0.0, %v482_v45  ;;  %vm1073_vm14 = vmand %vm289_vm7, %vm293_vm2 }
  0x70   : > { %486 = vst [vmem:[%s977_s22 + $0x20] sm:$0xff] %v355_v46  ;;  %vm305_vm0 = vmand %vm1038_vm1, %vm1073_vm14  ;;  %vm322_vm1 = vcmp.lt.s32.totalorder %v857_v3, %v320_v37 }
  0x71   : > { %vm1082_vm3 = vmand %vm327_vm13, %vm331_vm11 }
  0x72   : > { %vm343_vm7 = vmand %vm1056_vm8, %vm1082_vm3 }
  0x73   : > { %vm347_vm2 = vmor %vm305_vm0, %vm343_vm7 }
  0x74   : > { %v356_v50 = vsel %vm347_vm2, 0.0, %v483_v49  ;;  %vm1095_vm5 = vmand %vm280_vm15, %vm284_vm4 }
  0x75   : > { %487 = vst.msk [vmem:[%s977_s22 + $0x28] sm:$0xff] %vm264_vm12, %v356_v50  ;;  %vm306_vm13 = vmand %vm1095_vm5, %vm1046_vm10 }
  0x76   : > { %vm324_vm8 = vmand %vm318_vm9, %vm322_vm1 }
  0x77   : > { %vm344_vm11 = vmand %vm324_vm8, %vm1060_vm6 }
  0x78   : > { %vm348_vm0 = vmor %vm306_vm13, %vm344_vm11 }
  0x79   : > { %v357_v53 = vsel %vm348_vm0, 0.0, %v484_v52  ;;  %vm307_vm10 = vmand %vm1095_vm5, %vm1073_vm14 }
  0x7a   : > { %488 = vst [vmem:[%s977_s22 + $0x30] sm:$0xff] %v357_v53  ;;  %vm345_vm15 = vmand %vm324_vm8, %vm1082_vm3 }
  0x7b   : > { %vm349_vm6 = vmor %vm307_vm10, %vm345_vm15 }
  0x7c   : > { %v358_v55 = vsel %vm349_vm6, 0.0, %v485_v54 }
  0x7d   : > { %489 = vst.msk [vmem:[%s977_s22 + $0x38] sm:$0xff] %vm264_vm12, %v358_v55 }
  0x7e   : > { %625 = shalt.err (!%p622_p10)
}
  0x7f   : > { %s626_s9 = scalar_lea.hbm %s1123_s16, 1024  ;;  %s630_s10 = scalar_lea.hbm %s1176_s2, 2048 }
  0x80   : > { %p627_p9 = scmp.ne.s32.totalorder %s1123_s16, %s626_s9  ;;  %p631_p3 = scmp.lt.u32.totalorder %s1123_s16, %s1176_s2 }
  0x81   : > { %p632_p6 = scmp.lt.u32.totalorder %s630_s10, %s626_s9  ;;  %p634_p13 = scmp.lt.u32.totalorder %s626_s9, %s1123_s16 }
  0x82   : > { %p628_p12 = pnand %p627_p9, %p1222_p0 }
  0x83   : > { %p633_p8 = por %p632_p6, %p631_p3 }
  0x84   : > { %p629_p1 = pneg %p628_p12 }
  0x85   : > { %p635_p2 = por %p634_p13, %p633_p8 }
  0x87   : > { %p636_p5 = pnand %p635_p2, %p629_p1 }
  0x89   : > { %639 = shalt.err (!%p636_p5)
}
  0x8a   : > { %s703_s13 = smov 256   ;;  %s704_s19 = smov 16  }
  0x8b   : > { %505 = dma.vmem_to_hbm [thread:$0]  (%p1222_p0), %s1110_s23, 1024, %s1123_s16, %s365_s30, %s703_s13, %s703_s13, %s704_s19  }
  0x8c PF: > { %s396_s6 = sand.u32 1, %s676_s14   ;;  %p1223_p11 = scmp.ne.s32.totalorder %s1181_s28, 0 }
  0x8d   : > { %p1224_p4 = scmp.ge.s32.totalorder %s696_s18, 2  ;;  %s397_s24 = scalar_lea.sflag [#allocation6], %s396_s6 }
  0x8f   : > { %p512_p7 = pnand %p1224_p4, %p1223_p11 }
  0x91   : > { %671 = dma.done.wait (!%p512_p7), %s397_s24, 1024  }
  0x92   : > { %673 = vsyncadd (!%p512_p7), %s397_s24, 4294966272  ;;  %s24_s18 = sadd.s32 1, %s696_s18   ;;  %s1225_s14 = smov %s680_s0 }
  0x93   : > { %p21_p10 = scmp.ge.s32.totalorder %s24_s18, 4   ;;  %s1226_s0 = smov %s684_s15 }
  0x94   : > { %s1227_s15 = smov %s779_s27  ;;  %s1228_s16 = smov %s692_s17 }
  0x95   : > { %s1229_s17 = smov %s1231_s21  ;;  %23 = sbr.rel (!%p21_p10) target bundleno = 21 (0x15), region = 71 }
  0x9c   :  { %402 = vsyncpa [#allocation5], 1 }
  0x9d   :  { %404 = vsyncpa [#allocation5 + $0x1], 1 }
  0x9e   :  { %405 = vsyncpa [#allocation6], 1 }
  0x9f   :  { %407 = vsyncpa [#allocation6 + $0x1], 1 }

</bundles_post_ra>
